<compile_context>
chip_gen: v6e
topology: v6e:2x2x1
jax: 0.10.0
libtpu: 0.0.40
codegen_flags: <defaults>
</compile_context>

<pallas_src>
import functools

import numpy as np
import jax
import jax.numpy as jnp
from jax.experimental import pallas as pl
from jax.experimental.pallas import tpu as pltpu


def _pick_row_block(B, D, in_itemsize, budget_bytes=16 * 1024 * 1024):
    """Row-block size rb (divisor of B; multiple of 8 unless rb == B) such that
    the per-step resident VMEM footprint stays under `budget_bytes`."""

    def approx_bytes(rb):
        student = 2 * rb * D * in_itemsize          # double-buffered student block
        teacher = 2 * 2 * rb * D * in_itemsize      # teacher block (x2 buffers)
        scratch = 3 * rb * D * 4                    # t_soft (2*rb*D) + q_sum (rb*D), f32
        small = 6 * D * 4                           # center + csum blocks
        return student + teacher + scratch + small

    if approx_bytes(B) <= budget_bytes or B % 8 != 0:
        return B
    best = 8
    for rb in range(8, B + 1, 8):
        if B % rb == 0 and approx_bytes(rb) <= budget_bytes:
            best = rb
    return best


@functools.lru_cache(maxsize=None)
def _build_dino_loss_fn(ncrops, B, D, rb, student_temp, center_momentum):
    """Builds (once per static config) a jitted fn:
         (temp[1], student[ncrops*B, D], teacher[2*B, D], center[1, D])
           -> (loss scalar, new_center[1, D])
    """
    nrb = B // rb
    n_terms = 2 * ncrops - 2
    loss_scale = float(1.0 / (n_terms * B))
    inv_st = float(1.0 / student_temp)
    m = float(center_momentum)

    def kernel(temp_ref, student_ref, teacher_ref, center_ref,
               loss_ref, csum_ref, t_soft_ref, q_sum_ref, acc_ref):
        v = pl.program_id(1)          # student crop index (inner, "arbitrary")

        # ---- once per row block: teacher softmax + center row-sum + init ----
        @pl.when(v == 0)
        def _init():
            inv_temp = 1.0 / temp_ref[0]
            teacher = teacher_ref[...].astype(jnp.float32)          # (2, rb, D)
            center_f32 = center_ref[...].astype(jnp.float32)        # (1, D)
            centered = (teacher - center_f32[None]) * inv_temp
            t_max = jnp.max(centered, axis=-1, keepdims=True)
            t_exp = jnp.exp(centered - t_max)
            t_den = jnp.sum(t_exp, axis=-1, keepdims=True)
            t_soft = t_exp * pl.reciprocal(t_den, approx=False)     # (2, rb, D)
            t_soft_ref[...] = t_soft
            q_sum_ref[...] = t_soft[0] + t_soft[1]
            acc_ref[...] = jnp.zeros((1, 1), jnp.float32)
            # un-normalized center partial sum over this row block's teacher rows
            row_sum = jnp.sum(teacher[0] + teacher[1], axis=0, keepdims=True)  # (1, D)
            csum_ref[...] = row_sum.reshape(1, 1, D)

        # ---- per crop: student log-softmax on this row block ----
        student = student_ref[0].astype(jnp.float32) * inv_st        # (rb, D)
        s_max = jnp.max(student, axis=-1, keepdims=True)
        s_shift = student - s_max
        s_lse = jnp.log(jnp.sum(jnp.exp(s_shift), axis=-1, keepdims=True))
        lp = s_shift - s_lse                                         # (rb, D)

        # folded teacher-crop loop: subtract (q0+q1).lp, add back q_v.lp if v < 2
        term_all = jnp.sum(q_sum_ref[...] * lp, keepdims=True)       # (1, 1)
        acc_ref[...] = acc_ref[...] - term_all

        @pl.when(v < 2)
        def _self_correction():
            q_self = jnp.where(v == 0, t_soft_ref[0], t_soft_ref[1])  # (rb, D)
            acc_ref[...] = acc_ref[...] + jnp.sum(q_self * lp, keepdims=True)

        # ---- finalize this row block's partial loss ----
        @pl.when(v == ncrops - 1)
        def _finalize():
            loss_ref[...] = (acc_ref[...] * loss_scale).reshape(1, 1, 1)

    grid_spec = pltpu.PrefetchScalarGridSpec(
        num_scalar_prefetch=0,
        grid=(nrb, ncrops),
        in_specs=[
            pl.BlockSpec(memory_space=pltpu.MemorySpace.SMEM),          # temp (1,)
            pl.BlockSpec((1, rb, D), lambda r, v: (v, r, 0)),           # student (ncrops,B,D)
            pl.BlockSpec((2, rb, D), lambda r, v: (0, r, 0)),           # teacher (2,B,D)
            pl.BlockSpec((1, D), lambda r, v: (0, 0)),                  # center  (1,D)
        ],
        out_specs=(
            pl.BlockSpec((1, 1, 1), lambda r, v: (r, 0, 0)),            # loss partials
            pl.BlockSpec((1, 1, D), lambda r, v: (r, 0, 0)),            # teacher row sums
        ),
        scratch_shapes=[
            pltpu.VMEM((2, rb, D), jnp.float32),    # teacher softmax
            pltpu.VMEM((rb, D), jnp.float32),       # q0 + q1
            pltpu.VMEM((1, 1), jnp.float32),        # loss accumulator
        ],
    )

    pc = pl.pallas_call(
        kernel,
        grid_spec=grid_spec,
        out_shape=(
            jax.ShapeDtypeStruct((nrb, 1, 1), jnp.float32),
            jax.ShapeDtypeStruct((nrb, 1, D), jnp.float32),
        ),
        compiler_params=pltpu.CompilerParams(
            dimension_semantics=("parallel", "arbitrary"),
            vmem_limit_bytes=32 * 1024 * 1024,
        ),
    )

    def fn(temp, student, teacher, center):
        student3 = student.reshape(ncrops, B, D)      # native dtype on the wire
        teacher3 = teacher.reshape(2, B, D)
        center_f32 = center.astype(jnp.float32)
        loss_parts, center_sums = pc(temp, student3, teacher3, center_f32)
        loss = jnp.sum(loss_parts)
        # single-device: dist.all_reduce is identity, world_size == 1
        batch_center = jnp.sum(center_sums, axis=0) / jnp.float32(2 * B)   # (1, D)
        new_center = center_f32 * m + batch_center * (1.0 - m)
        return loss, new_center

    return jax.jit(fn)


class DINOLossPallas:
    """JAX/Pallas port of the PyTorch DINOLoss module (single device)."""

    def __init__(self, out_dim, ncrops, warmup_teacher_temp, teacher_temp,
                 warmup_teacher_temp_epochs, nepochs,
                 student_temp=0.1, center_momentum=0.9):
        self.out_dim = out_dim
        self.ncrops = ncrops
        self.student_temp = float(student_temp)
        self.center_momentum = float(center_momentum)
        self.center = jnp.zeros((1, out_dim), jnp.float32)
        self.teacher_temp_schedule = np.concatenate((
            np.linspace(warmup_teacher_temp, teacher_temp,
                        warmup_teacher_temp_epochs),
            np.ones(nepochs - warmup_teacher_temp_epochs) * teacher_temp))

    def __call__(self, student_output, teacher_output, epoch):
        D = self.out_dim
        n_student_rows, d_s = student_output.shape
        assert d_s == D and n_student_rows % self.ncrops == 0
        B = n_student_rows // self.ncrops
        assert teacher_output.shape == (2 * B, D)

        itemsize = jnp.dtype(student_output.dtype).itemsize
        rb = _pick_row_block(B, D, itemsize)
        fn = _build_dino_loss_fn(self.ncrops, B, D, rb,
                                 self.student_temp, self.center_momentum)

        temp = jnp.asarray([self.teacher_temp_schedule[int(epoch)]], jnp.float32)
        loss, new_center = fn(temp, student_output, teacher_output, self.center)
        self.center = new_center         # mirrors the PyTorch buffer mutation
        return loss


def _reference(student_output, teacher_output, center, ncrops, student_temp,
               teacher_temp, center_momentum):
    """Pure-NumPy reference mirroring the PyTorch forward (single device)."""
    student = np.asarray(student_output, np.float32) / student_temp
    teacher = (np.asarray(teacher_output, np.float32) -
               np.asarray(center, np.float32)) / teacher_temp
    t = teacher - teacher.max(-1, keepdims=True)
    t = np.exp(t); t /= t.sum(-1, keepdims=True)
    s = student - student.max(-1, keepdims=True)
    s = s - np.log(np.exp(s).sum(-1, keepdims=True))
    B = teacher.shape[0] // 2
    t_chunks = [t[i * B:(i + 1) * B] for i in range(2)]
    s_chunks = [s[v * B:(v + 1) * B] for v in range(ncrops)]
    total, n = 0.0, 0
    for iq, q in enumerate(t_chunks):
        for v in range(ncrops):
            if v == iq:
                continue
            total += np.mean(np.sum(-q * s_chunks[v], axis=-1))
            n += 1
    loss = total / n
    bc = np.asarray(teacher_output, np.float32).sum(0, keepdims=True) / teacher.shape[0]
    new_center = (np.asarray(center, np.float32) * center_momentum +
                  bc * (1 - center_momentum))
    return loss, new_center


if __name__ == "__main__":
    # Small, forward-consistent shapes.
    out_dim = 128
    ncrops = 4
    B = 2                        # batch per crop
    epoch = 3
    nepochs = 10
    warmup_teacher_temp, teacher_temp, warmup_epochs = 0.04, 0.07, 5

    key = jax.random.PRNGKey(0)
    k1, k2 = jax.random.split(key)
    student_output = jax.random.normal(k1, (ncrops * B, out_dim), jnp.float32)
    teacher_output = jax.random.normal(k2, (2 * B, out_dim), jnp.float32)

    dino = DINOLossPallas(out_dim, ncrops, warmup_teacher_temp, teacher_temp,
                          warmup_epochs, nepochs)
    center_before = np.asarray(dino.center)

    loss = dino(student_output, teacher_output, epoch)
    loss = jax.block_until_ready(loss)
    new_center = jax.block_until_ready(dino.center)

    ref_loss, ref_center = _reference(
        np.asarray(student_output), np.asarray(teacher_output),
        center_before, ncrops, dino.student_temp,
        float(dino.teacher_temp_schedule[epoch]), dino.center_momentum)
    np.testing.assert_allclose(np.asarray(loss), ref_loss, rtol=2e-5, atol=2e-5)
    np.testing.assert_allclose(np.asarray(new_center), ref_center,
                               rtol=1e-5, atol=1e-6)

    print("KERNEL_OK")
</pallas_src>

<mosaic_0001>
module attributes {stable_mosaic.version = 11 : i64} {
  func.func @kernel(%arg0: i32, %arg1: i32, %arg2: memref<1xf32, #tpu.memory_space<smem>>, %arg3: memref<1x2x128xf32, #tpu.memory_space<vmem>>, %arg4: memref<2x2x128xf32, #tpu.memory_space<vmem>>, %arg5: memref<1x128xf32, #tpu.memory_space<vmem>>, %arg6: memref<1x1x1xf32, #tpu.memory_space<vmem>>, %arg7: memref<1x1x128xf32, #tpu.memory_space<vmem>>, %arg8: memref<2x2x128xf32, #tpu.memory_space<vmem>>, %arg9: memref<2x128xf32, #tpu.memory_space<vmem>>, %arg10: memref<1x1xf32, #tpu.memory_space<vmem>>) attributes {dimension_semantics = [#tpu.dimension_semantics<parallel>, #tpu.dimension_semantics<arbitrary>], iteration_bounds = array<i64: 1, 4>, scalar_prefetch = 0 : i64, scratch_operands = 3 : i64, tpu.core_type = #tpu.core_type<tc>, window_params = [{transform_indices = @transform_0, window_bounds = array<i64: 1>}, {transform_indices = @transform_1, window_bounds = array<i64: 1, 2, 128>}, {transform_indices = @transform_2, window_bounds = array<i64: 2, 2, 128>}, {pipeline_mode = #tpu.pipeline_mode<synchronous>, transform_indices = @transform_3, window_bounds = array<i64: 1, 128>}, {transform_indices = @transform_4, window_bounds = array<i64: 1, 1, 1>}, {transform_indices = @transform_5, window_bounds = array<i64: 1, 1, 128>}]} {
    %c0_i32 = arith.constant 0 : i32
    %0 = arith.cmpi eq, %arg1, %c0_i32 : i32
    %1 = arith.extui %0 : i1 to i32
    %c0_i32_0 = arith.constant 0 : i32
    %2 = arith.cmpi ne, %1, %c0_i32_0 : i32
    scf.if %2 {
      %c0_14 = arith.constant 0 : index
      %33 = memref.load %arg2[%c0_14] : memref<1xf32, #tpu.memory_space<smem>>
      %cst_15 = arith.constant 1.000000e+00 : f32
      %34 = arith.divf %cst_15, %33 : f32
      %c0_16 = arith.constant 0 : index
      %c0_17 = arith.constant 0 : index
      %c0_18 = arith.constant 0 : index
      %35 = vector.load %arg4[%c0_16, %c0_17, %c0_18] : memref<2x2x128xf32, #tpu.memory_space<vmem>>, vector<2x2x128xf32>
      %c0_19 = arith.constant 0 : index
      %c0_20 = arith.constant 0 : index
      %36 = vector.load %arg5[%c0_19, %c0_20] : memref<1x128xf32, #tpu.memory_space<vmem>>, vector<1x128xf32>
      %37 = vector.shape_cast %36 : vector<1x128xf32> to vector<1x1x128xf32>
      %38 = vector.broadcast %37 : vector<1x1x128xf32> to vector<2x2x128xf32>
      %39 = arith.subf %35, %38 : vector<2x2x128xf32>
      %40 = vector.broadcast %34 : f32 to vector<2x2x128xf32>
      %41 = arith.mulf %39, %40 : vector<2x2x128xf32>
      %cst_21 = arith.constant dense<0xFF800000> : vector<2x2xf32>
      %42 = vector.multi_reduction <maximumf>, %41, %cst_21 [2] : vector<2x2x128xf32> to vector<2x2xf32>
      %43 = vector.shape_cast %42 : vector<2x2xf32> to vector<2x2x1xf32>
      %44 = vector.broadcast %43 : vector<2x2x1xf32> to vector<2x2x128xf32>
      %45 = arith.subf %41, %44 : vector<2x2x128xf32>
      %46 = math.exp %45 : vector<2x2x128xf32>
      %cst_22 = arith.constant dense<0.000000e+00> : vector<2x2xf32>
      %47 = vector.multi_reduction <add>, %46, %cst_22 [2] : vector<2x2x128xf32> to vector<2x2xf32>
      %48 = vector.shape_cast %47 : vector<2x2xf32> to vector<2x2x1xf32>
      %49 = tpu.reciprocal %48 : vector<2x2x1xf32> -> vector<2x2x1xf32>
      %50 = vector.broadcast %49 : vector<2x2x1xf32> to vector<2x2x128xf32>
      %51 = arith.mulf %46, %50 : vector<2x2x128xf32>
      %c0_23 = arith.constant 0 : index
      %c0_24 = arith.constant 0 : index
      %c0_25 = arith.constant 0 : index
      %52 = vector.load %arg8[%c0_23, %c0_24, %c0_25] : memref<2x2x128xf32, #tpu.memory_space<vmem>>, vector<2x2x128xf32>
      tpu.vector_store %arg8[%c0_23, %c0_24, %c0_25], %51 {strides = array<i32>} : memref<2x2x128xf32, #tpu.memory_space<vmem>>, vector<2x2x128xf32>,
      %53 = vector.extract_strided_slice %51 {offsets = [0, 0, 0], sizes = [1, 2, 128], strides = [1, 1, 1]} : vector<2x2x128xf32> to vector<1x2x128xf32>
      %54 = vector.shape_cast %53 : vector<1x2x128xf32> to vector<2x128xf32>
      %55 = vector.extract_strided_slice %51 {offsets = [1, 0, 0], sizes = [1, 2, 128], strides = [1, 1, 1]} : vector<2x2x128xf32> to vector<1x2x128xf32>
      %56 = vector.shape_cast %55 : vector<1x2x128xf32> to vector<2x128xf32>
      %57 = arith.addf %54, %56 : vector<2x128xf32>
      %c0_26 = arith.constant 0 : index
      %c0_27 = arith.constant 0 : index
      %58 = vector.load %arg9[%c0_26, %c0_27] : memref<2x128xf32, #tpu.memory_space<vmem>>, vector<2x128xf32>
      tpu.vector_store %arg9[%c0_26, %c0_27], %57 {strides = array<i32>} : memref<2x128xf32, #tpu.memory_space<vmem>>, vector<2x128xf32>,
      %cst_28 = arith.constant 0.000000e+00 : f32
      %59 = vector.broadcast %cst_28 : f32 to vector<1x1xf32>
      %c0_29 = arith.constant 0 : index
      %c0_30 = arith.constant 0 : index
      %60 = vector.load %arg10[%c0_29, %c0_30] : memref<1x1xf32, #tpu.memory_space<vmem>>, vector<1x1xf32>
      tpu.vector_store %arg10[%c0_29, %c0_30], %59 {strides = array<i32>} : memref<1x1xf32, #tpu.memory_space<vmem>>, vector<1x1xf32>,
      %61 = vector.extract_strided_slice %35 {offsets = [0, 0, 0], sizes = [1, 2, 128], strides = [1, 1, 1]} : vector<2x2x128xf32> to vector<1x2x128xf32>
      %62 = vector.shape_cast %61 : vector<1x2x128xf32> to vector<2x128xf32>
      %63 = vector.extract_strided_slice %35 {offsets = [1, 0, 0], sizes = [1, 2, 128], strides = [1, 1, 1]} : vector<2x2x128xf32> to vector<1x2x128xf32>
      %64 = vector.shape_cast %63 : vector<1x2x128xf32> to vector<2x128xf32>
      %65 = arith.addf %62, %64 : vector<2x128xf32>
      %cst_31 = arith.constant dense<0.000000e+00> : vector<128xf32>
      %66 = vector.multi_reduction <add>, %65, %cst_31 [0] : vector<2x128xf32> to vector<128xf32>
      %67 = vector.shape_cast %66 : vector<128xf32> to vector<1x128xf32>
      %68 = vector.shape_cast %67 : vector<1x128xf32> to vector<1x1x128xf32>
      %c0_32 = arith.constant 0 : index
      %c0_33 = arith.constant 0 : index
      %c0_34 = arith.constant 0 : index
      %69 = vector.load %arg7[%c0_32, %c0_33, %c0_34] : memref<1x1x128xf32, #tpu.memory_space<vmem>>, vector<1x1x128xf32>
      tpu.vector_store %arg7[%c0_32, %c0_33, %c0_34], %68 {strides = array<i32>} : memref<1x1x128xf32, #tpu.memory_space<vmem>>, vector<1x1x128xf32>,
    } else {
    }
    %c0 = arith.constant 0 : index
    %c0_1 = arith.constant 0 : index
    %c0_2 = arith.constant 0 : index
    %3 = vector.load %arg3[%c0, %c0_1, %c0_2] : memref<1x2x128xf32, #tpu.memory_space<vmem>>, vector<1x2x128xf32>
    %4 = vector.shape_cast %3 : vector<1x2x128xf32> to vector<2x128xf32>
    %cst = arith.constant 1.000000e+01 : f32
    %5 = vector.broadcast %cst : f32 to vector<2x128xf32>
    %6 = arith.mulf %4, %5 : vector<2x128xf32>
    %cst_3 = arith.constant dense<0xFF800000> : vector<2xf32>
    %7 = vector.multi_reduction <maximumf>, %6, %cst_3 [1] : vector<2x128xf32> to vector<2xf32>
    %8 = vector.shape_cast %7 : vector<2xf32> to vector<2x1xf32>
    %9 = vector.broadcast %8 : vector<2x1xf32> to vector<2x128xf32>
    %10 = arith.subf %6, %9 : vector<2x128xf32>
    %11 = math.exp %10 : vector<2x128xf32>
    %cst_4 = arith.constant dense<0.000000e+00> : vector<2xf32>
    %12 = vector.multi_reduction <add>, %11, %cst_4 [1] : vector<2x128xf32> to vector<2xf32>
    %13 = vector.shape_cast %12 : vector<2xf32> to vector<2x1xf32>
    %14 = math.log %13 : vector<2x1xf32>
    %15 = vector.broadcast %14 : vector<2x1xf32> to vector<2x128xf32>
    %16 = arith.subf %10, %15 : vector<2x128xf32>
    %c0_5 = arith.constant 0 : index
    %c0_6 = arith.constant 0 : index
    %17 = vector.load %arg9[%c0_5, %c0_6] : memref<2x128xf32, #tpu.memory_space<vmem>>, vector<2x128xf32>
    %18 = arith.mulf %17, %16 : vector<2x128xf32>
    %19 = vector.shape_cast %18 : vector<2x128xf32> to vector<1x2x128xf32>
    %cst_7 = arith.constant dense<0.000000e+00> : vector<1xf32>
    %20 = vector.multi_reduction <add>, %19, %cst_7 [1, 2] : vector<1x2x128xf32> to vector<1xf32>
    %21 = vector.shape_cast %20 : vector<1xf32> to vector<1x1x1xf32>
    %22 = vector.extract %21[0, 0, 0] : f32 from vector<1x1x1xf32>
    %23 = vector.broadcast %22 : f32 to vector<1x1xf32>
    %c0_8 = arith.constant 0 : index
    %c0_9 = arith.constant 0 : index
    %24 = vector.load %arg10[%c0_8, %c0_9] : memref<1x1xf32, #tpu.memory_space<vmem>>, vector<1x1xf32>
    %25 = arith.subf %24, %23 : vector<1x1xf32>
    %c0_10 = arith.constant 0 : index
    %c0_11 = arith.constant 0 : index
    %26 = vector.load %arg10[%c0_10, %c0_11] : memref<1x1xf32, #tpu.memory_space<vmem>>, vector<1x1xf32>
    tpu.vector_store %arg10[%c0_10, %c0_11], %25 {strides = array<i32>} : memref<1x1xf32, #tpu.memory_space<vmem>>, vector<1x1xf32>,
    %c2_i32 = arith.constant 2 : i32
    %27 = arith.cmpi slt, %arg1, %c2_i32 : i32
    %28 = arith.extui %27 : i1 to i32
    %c0_i32_12 = arith.constant 0 : i32
    %29 = arith.cmpi ne, %28, %c0_i32_12 : i32
    scf.if %29 {
      %c0_i32_14 = arith.constant 0 : i32
      %33 = arith.cmpi eq, %arg1, %c0_i32_14 : i32
      %c0_15 = arith.constant 0 : index
      %c0_16 = arith.constant 0 : index
      %c0_17 = arith.constant 0 : index
      %34 = vector.load %arg8[%c0_15, %c0_16, %c0_17] : memref<2x2x128xf32, #tpu.memory_space<vmem>>, vector<1x2x128xf32>
      %35 = vector.shape_cast %34 : vector<1x2x128xf32> to vector<2x128xf32>
      %c1 = arith.constant 1 : index
      %c0_18 = arith.constant 0 : index
      %c0_19 = arith.constant 0 : index
      %36 = vector.load %arg8[%c1, %c0_18, %c0_19] : memref<2x2x128xf32, #tpu.memory_space<vmem>>, vector<1x2x128xf32>
      %37 = vector.shape_cast %36 : vector<1x2x128xf32> to vector<2x128xf32>
      %38 = arith.select %33, %35, %37 : vector<2x128xf32>
      %c0_20 = arith.constant 0 : index
      %c0_21 = arith.constant 0 : index
      %39 = vector.load %arg10[%c0_20, %c0_21] : memref<1x1xf32, #tpu.memory_space<vmem>>, vector<1x1xf32>
      %40 = arith.mulf %38, %16 : vector<2x128xf32>
      %41 = vector.shape_cast %40 : vector<2x128xf32> to vector<1x2x128xf32>
      %cst_22 = arith.constant dense<0.000000e+00> : vector<1xf32>
      %42 = vector.multi_reduction <add>, %41, %cst_22 [1, 2] : vector<1x2x128xf32> to vector<1xf32>
      %43 = vector.shape_cast %42 : vector<1xf32> to vector<1x1x1xf32>
      %44 = vector.extract %43[0, 0, 0] : f32 from vector<1x1x1xf32>
      %45 = vector.broadcast %44 : f32 to vector<1x1xf32>
      %46 = arith.addf %39, %45 : vector<1x1xf32>
      %c0_23 = arith.constant 0 : index
      %c0_24 = arith.constant 0 : index
      %47 = vector.load %arg10[%c0_23, %c0_24] : memref<1x1xf32, #tpu.memory_space<vmem>>, vector<1x1xf32>
      tpu.vector_store %arg10[%c0_23, %c0_24], %46 {strides = array<i32>} : memref<1x1xf32, #tpu.memory_space<vmem>>, vector<1x1xf32>,
    } else {
    }
    %c3_i32 = arith.constant 3 : i32
    %30 = arith.cmpi eq, %arg1, %c3_i32 : i32
    %31 = arith.extui %30 : i1 to i32
    %c0_i32_13 = arith.constant 0 : i32
    %32 = arith.cmpi ne, %31, %c0_i32_13 : i32
    scf.if %32 {
      %c0_14 = arith.constant 0 : index
      %c0_15 = arith.constant 0 : index
      %33 = vector.load %arg10[%c0_14, %c0_15] : memref<1x1xf32, #tpu.memory_space<vmem>>, vector<1x1xf32>
      %cst_16 = arith.constant 0.0833333358 : f32
      %34 = vector.broadcast %cst_16 : f32 to vector<1x1xf32>
      %35 = arith.mulf %33, %34 : vector<1x1xf32>
      %36 = vector.shape_cast %35 : vector<1x1xf32> to vector<1x1x1xf32>
      %c0_17 = arith.constant 0 : index
      %c0_18 = arith.constant 0 : index
      %c0_19 = arith.constant 0 : index
      %37 = vector.load %arg6[%c0_17, %c0_18, %c0_19] : memref<1x1x1xf32, #tpu.memory_space<vmem>>, vector<1x1x1xf32>
      tpu.vector_store %arg6[%c0_17, %c0_18, %c0_19], %36 {strides = array<i32>} : memref<1x1x1xf32, #tpu.memory_space<vmem>>, vector<1x1x1xf32>,
    } else {
    }
    return
  }
  func.func @transform_0(%arg0: i32, %arg1: i32) -> i32 {
    %c0_i32 = arith.constant 0 : i32
    %c0_i32_0 = arith.constant 0 : i32
    return %c0_i32 : i32
  }
  func.func @transform_1(%arg0: i32, %arg1: i32) -> (i32, i32, i32) {
    %c0_i32 = arith.constant 0 : i32
    %c0_i32_0 = arith.constant 0 : i32
    return %arg1, %arg0, %c0_i32 : i32, i32, i32
  }
  func.func @transform_2(%arg0: i32, %arg1: i32) -> (i32, i32, i32) {
    %c0_i32 = arith.constant 0 : i32
    %c0_i32_0 = arith.constant 0 : i32
    %c0_i32_1 = arith.constant 0 : i32
    return %c0_i32, %arg0, %c0_i32_0 : i32, i32, i32
  }
  func.func @transform_3(%arg0: i32, %arg1: i32) -> (i32, i32) {
    %c0_i32 = arith.constant 0 : i32
    %c0_i32_0 = arith.constant 0 : i32
    %c0_i32_1 = arith.constant 0 : i32
    return %c0_i32, %c0_i32_0 : i32, i32
  }
  func.func @transform_4(%arg0: i32, %arg1: i32) -> (i32, i32, i32) {
    %c0_i32 = arith.constant 0 : i32
    %c0_i32_0 = arith.constant 0 : i32
    %c0_i32_1 = arith.constant 0 : i32
    return %arg0, %c0_i32, %c0_i32_0 : i32, i32, i32
  }
  func.func @transform_5(%arg0: i32, %arg1: i32) -> (i32, i32, i32) {
    %c0_i32 = arith.constant 0 : i32
    %c0_i32_0 = arith.constant 0 : i32
    %c0_i32_1 = arith.constant 0 : i32
    return %arg0, %c0_i32, %c0_i32_0 : i32, i32, i32
  }
}

</mosaic_0001>

<bundles_post_ra>
// kernel: fn.1
= control target key start
LH: loop header
LB: loop body
LE: loop exit
PB: predicated region body
PF: predicated region fallthrough
CT: control target
= control target key end

     0   :  { %s901_s0 = inlined_call_operand.<no memory space> [shape: f32[1], index: 0, kind: input, shape index: {}]   ;;  %s902_s1 = inlined_call_operand.hbm [shape: f32[4,2,128], index: 1, kind: input, shape index: {}]   ;;  %s903_s2 = inlined_call_operand.vmem [shape: f32[2,2,128], index: 2, kind: input, shape index: {}]   ;;  %s904_s3 = inlined_call_operand.vmem [shape: f32[1,128], index: 3, kind: input, shape index: {}]   ;;  %s905_s4 = inlined_call_operand.hbm [shape: f32[1,1,1], index: 4, kind: output, shape index: {0}]   ;;  %s906_s5 = inlined_call_operand.vmem [shape: f32[1,1,128], index: 5, kind: output, shape index: {1}]  }
   0x1   :  { %11 = sst [smem:[#allocation5]] %s901_s0 }
   0x2   :  { %12 = vsyncpa [#allocation7], 0 }
   0x3   :  { %14 = vsyncpa [#allocation7 + $0x1], 0 }
   0x4   :  { %15 = vsyncpa [#allocation8], 0  ;;  %s752_s20 = smov 0   ;;  %s754_s21 = smov 0  }
   0x5   :  { %s756_s22 = smov 0   ;;  %s758_s23 = smov 0  }
   0x6   :  { %s760_s24 = smov 0   ;;  %s762_s25 = smov 0  }
   0x7 LB: > { %s508_s0 = sadd.s32 4294967295, %s714_s25   ;;  %s30_s26 = sadd.s32 1, %s710_s24  ;;  %s714_s25 = sphi %s762_s25, %s21_s25   ;;  %s710_s24 = sphi %s760_s24, %s915_s24   ;;  %s706_s23 = sphi %s758_s23, %s914_s23   ;;  %s702_s22 = sphi %s756_s22, %s913_s22   ;;  %s698_s21 = sphi %s754_s21, %s912_s21   ;;  %s694_s20 = sphi %s752_s20, %s911_s20  }
   0x8   : > { %p31_p0 = scmp.ge.s32.totalorder %s30_s26, 4  ;;  %s63_s27 = sadd.s32 1, %s702_s22 }
   0x9   : > { %p70_p1 = scmp.ne.s32.totalorder %s702_s22, %s698_s21  ;;  %p71_p2 = scmp.eq.s32.totalorder %s714_s25, 0 }
   0xa   : > { %s917_s26 = smov (%p31_p0, %s30_s26), 0  ;;  %p76_p4 = scmp.ne.s32.totalorder %s698_s21, %s694_s20 }
   0xb   : > { %p788_p3 = por %p71_p2, %p70_p1  ;;  %s58_s29 = ssub.s32 %s710_s24, %s917_s26 }
   0xc   : > { %p77_p5 = scmp.eq.s32.totalorder %s508_s0, 0  ;;  %p61_p6 = scmp.eq.s32.totalorder %s58_s29, 0 }
   0xd   : > { %p541_p8 = scmp.lt.s32.totalorder %s714_s25, 4  ;;  %s212_s7 = sand.u32 1, %s702_s22  }
   0xe   : > { %p797_p7 = por %p77_p5, %p76_p4  ;;  %s513_s8 = sshll.u32 %s710_s24, 5 }
   0xf   : > { %s803_s6 = scalar_select %p61_p6, %s702_s22, %s63_s27  }
  0x10   : > { %s512_s9 = sshll.u32 %s212_s7, 1  ;;  %s222_s12 = scalar_lea.hbm %s902_s1, %s513_s8 }
  0x11   : > { %s216_s13 = scalar_lea.vmem [#allocation6], %s512_s9  ;;  %p812_p9 = pnand %p541_p8, %p788_p3 }
  0x12   : > { %s224_s14 = sshll.u32 %s216_s13, 4  ;;  %p514_p10 = scmp.ge.s32.totalorder %s714_s25, 1  ;;  %s225_s14 = int_to_ptr.vmem [resolvable:$true] %s224_s14 }
  0x13   : > { %p229_p11 = scmp.lt.s32.totalorder %s714_s25, 5  ;;  %s213_s16 = scalar_lea.sflag [#allocation7], %s212_s7 }
  0x14   : > { %p610_p12 = pneg %p812_p9  ;;  %s621_s17 = scalar_lea.vmem %s225_s14, 32 }
  0x15   : > { %p622_p13 = scmp.ne.s32.totalorder %s225_s14, %s621_s17  ;;  %s716_s18 = smov [#allocation6]  }
  0x16   : > { %s626_s19 = sshll.u32 %s716_s18, 4  ;;  %s627_s19 = int_to_ptr.vmem [resolvable:$false] %s626_s19 }
  0x17   : > { %p624_p0 = pnand %p622_p13, %p610_p12  ;;  %s628_s20 = scalar_lea.vmem %s627_s19, 64 }
  0x18   : > { %p629_p2 = scmp.lt.s32.totalorder %s225_s14, %s627_s19  ;;  %p630_p3 = scmp.lt.s32.totalorder %s628_s20, %s621_s17 }
  0x19   : > { %p625_p1 = pneg %p624_p0 }
  0x1a   : > { %p631_p4 = por %p630_p3, %p629_p2 }
  0x1c   : > { %p632_p5 = pnand %p631_p4, %p625_p1 }
  0x1e   : > { %635 = shalt.err (!%p632_p5)
}
  0x1f   : > { %540 = dma.hbm_to_vmem [thread:$0]  (!%p812_p9), %s222_s12, 32, %s225_s14, %s213_s16  }
  0x20   : > { %p230_p6 = pnand %p514_p10, %p229_p11 }
  0x21   : > { %s235_s27 = sand.u32 (!%p230_p6), 1, %s698_s21  }
  0x22   : > { %233 = sbr.rel (%p230_p6) target bundleno = 1196 (0x4ac), region = 36  ;;  %s827_s28 = sshll.u32 (!%p230_p6), %s235_s27, 1 }
  0x23   : > { %s236_s29 = scalar_lea.sflag (!%p230_p6), [#allocation7], %s235_s27  ;;  %s239_s7 = scalar_lea.vmem (!%p230_p6), [#allocation6], %s827_s28 }
  0x27   : > { %685 = dma.done.wait (%p797_p7), %s236_s29, 32  }
  0x28   : > { %687 = vsyncadd (%p797_p7), %s236_s29, 4294967264  ;;  %p275_p8 = scmp.eq.s32.totalorder %s706_s23, 0  ;;  %p516_p9 = scmp.ne.s32.totalorder %s706_s23, 0 }
  0x29   : > { %s279_s8 = sld [smem:[#allocation5]] (!%p516_p9) }
  0x2a   : > { %278 = sbr.rel (%p516_p9) target bundleno = 434 (0x1b2), region = 44 }
  0x2f   : > { %v283_v0 = vld [vmem:[%s903_s2] sm:$0x3]  ;;  %v284_v1 = vld [vmem:[%s903_s2 + $0x2] sm:$0x3]  ;;  %vm297_vm0 = vcmask 1041408   ;;  %v280_v5 = vstv %s279_s8  ;;  %vm324_vm1 = vcmask 0  }
  0x30   : > { %v326_v2 = vadd.f32 %v284_v1, %v283_v0  ;;  %594 = vrcp.f32 %v280_v5  ;;  %v517_v12 = vld [vmem:[%s904_s3] ss:$0 sm:$0xff]  ;;  %v717_v30 = vmov 0.0  }
  0x31   : > { %v292_v13 = vsub.f32 %v283_v0, %v517_v12  ;;  %v293_v14 = vsub.f32 %v284_v1, %v517_v12  ;;  %325 = vst.msk [vmem:[#allocation4] sm:$0x1] %vm324_vm1, %v717_v30 }
  0x32   : > { %v327_v3 = vsel %vm297_vm0, %v326_v2, 0.0 }
  0x33   : > { %v328_v4 = vrot.slane %v327_v3, 4 }
  0x35   : > { %v329_v6 = vadd.f32 %v328_v4, %v327_v3 }
  0x37   : > { %v330_v7 = vrot.slane %v329_v6, 2 }
  0x39   : > { %v331_v8 = vadd.f32 %v330_v7, %v329_v6 }
  0x3b   : > { %v332_v9 = vrot.slane %v331_v8, 1 }
  0x3d   : > { %v333_v10 = vadd.f32 %v332_v9, %v331_v8  ;;  %v595_v11 = vpop.eup %594 }
  0x3e   : > { %525 = vpush %v595_v11 }
  0x3f   : > { %334 = vst [vmem:[%s906_s5] sm:$0x1] %v333_v10 }
  0x6f   : > { %s526_s16 = spop %525 }
  0x70   : > { %v294_v15 = vstv %s526_s16 }
  0x71   : > { %v295_v16 = vmul.f32 %v294_v15, %v292_v13  ;;  %v296_v17 = vmul.f32 %v294_v15, %v293_v14 }
  0x73   : > { %v298_v18 = vsel %vm297_vm0, %v295_v16, -inf  ;;  %v301_v19 = vsel %vm297_vm0, %v296_v17, -inf }
  0x74   : > { %299 = vmax.xlane.f32.xlu0 %v298_v18 }
  0x78   : > { %302 = vmax.xlane.f32.xlu0 %v301_v19 }
  0xfd   : > { %v300_v20 = vpop.xlane.xlu0 %299 }
  0xfe   : > { %v304_v21 = vsub.f32 %v295_v16, %v300_v20 }
 0x100   : > { %v306_v22 = vmul.f32 1.442695, %v304_v21 }
 0x101   : > { %v303_v23 = vpop.xlane.xlu0 %302 }
 0x102   : > { %596 = vpow2.f32 %v306_v22  ;;  %v305_v24 = vsub.f32 %v296_v17, %v303_v23 }
 0x104   : > { %v308_v25 = vmul.f32 1.442695, %v305_v24 }
 0x106   : > { %598 = vpow2.f32 %v308_v25 }
 0x10f   : > { %v597_v26 = vpop.eup %596 }
 0x110   : > { %v310_v27 = vsel %vm297_vm0, %v597_v26, 0.0 }
 0x111   : > { %311 = vadd.xlane.f32.xlu1 %v310_v27 }
 0x113   : > { %v599_v28 = vpop.eup %598 }
 0x114   : > { %v313_v29 = vsel %vm297_vm0, %v599_v28, 0.0 }
 0x115   : > { %314 = vadd.xlane.f32.xlu1 %v313_v29 }
 0x19a   : > { %v312_v31 = vpop.xlane.xlu1 %311 }
 0x19b   : > { %600 = vrcp.f32 %v312_v31 }
 0x19e   : > { %v315_v32 = vpop.xlane.xlu1 %314 }
 0x19f   : > { %602 = vrcp.f32 %v315_v32 }
 0x1a8   : > { %v601_v33 = vpop.eup %600 }
 0x1a9   : > { %v318_v34 = vmul.f32 %v601_v33, %v597_v26 }
 0x1ab   : > { %320 = vst [vmem:[#allocation2] sm:$0x3] %v318_v34 }
 0x1ac   : > { %v603_v35 = vpop.eup %602 }
 0x1ad   : > { %v319_v36 = vmul.f32 %v603_v35, %v599_v28 }
 0x1af   : > { %321 = vst [vmem:[#allocation2 + $0x2] sm:$0x3] %v319_v36  ;;  %v322_v37 = vadd.f32 %v319_v36, %v318_v34 }
 0x1b1   : > { %323 = vst [vmem:[#allocation3] sm:$0x3] %v322_v37 }
 0x1b2 PF: > { %v335_v38 = vld [vmem:[%s239_s7] sm:$0x3]  ;;  %vm337_vm2 = vcmask 1041408   ;;  %v363_v60 = vld [vmem:[#allocation4] sm:$0x1]  ;;  %vm365_vm3 = vcmask 0  }
 0x1b3   : > { %v336_v39 = vmul.f32 10.0, %v335_v38  ;;  %p518_p7 = scmp.ge.s32.totalorder %s706_s23, 2 }
 0x1b5   : > { %v338_v40 = vsel %vm337_vm2, %v336_v39, -inf }
 0x1b6   : > { %339 = vmax.xlane.f32.xlu0 %v338_v40 }
 0x1b8   : > { %v350_v49 = vld [vmem:[#allocation3] sm:$0x3] }
 0x23f   : > { %v340_v41 = vpop.xlane.xlu0 %339 }
 0x240   : > { %v341_v42 = vsub.f32 %v336_v39, %v340_v41 }
 0x242   : > { %v342_v43 = vmul.f32 1.442695, %v341_v42 }
 0x244   : > { %604 = vpow2.f32 %v342_v43 }
 0x251   : > { %v605_v44 = vpop.eup %604 }
 0x252   : > { %v344_v45 = vsel %vm337_vm2, %v605_v44, 0.0 }
 0x253   : > { %345 = vadd.xlane.f32.xlu0 %v344_v45 }
 0x2dc   : > { %v346_v46 = vpop.xlane.xlu0 %345 }
 0x2dd   : > { %606 = vlog2.f32 %v346_v46 }
 0x2ea   : > { %v607_v47 = vpop.eup %606 }
 0x2eb   : > { %v348_v48 = vmul.f32 0.6931472, %v607_v47 }
 0x2ed   : > { %v349_v50 = vsub.f32 %v341_v42, %v348_v48 }
 0x2ef   : > { %v351_v51 = vmul.f32 %v350_v49, %v349_v50 }
 0x2f1   : > { %v352_v52 = vsel %vm337_vm2, %v351_v51, 0.0 }
 0x2f2   : > { %353 = vadd.xlane.f32.xlu1 %v352_v52 }
 0x37b   : > { %v354_v53 = vpop.xlane.xlu1 %353 }
 0x37c   : > { %v355_v54 = vrot.slane %v354_v53, 4 }
 0x37e   : > { %v356_v55 = vadd.f32 %v355_v54, %v354_v53 }
 0x380   : > { %v357_v56 = vrot.slane %v356_v55, 2 }
 0x382   : > { %v358_v57 = vadd.f32 %v357_v56, %v356_v55 }
 0x384   : > { %v359_v58 = vrot.slane %v358_v57, 1 }
 0x386   : > { %v360_v59 = vadd.f32 %v359_v58, %v358_v57 }
 0x388   : > { %527 = vpush %v360_v59 }
 0x3b9   : > { %s528_s17 = spop %527  ;;  %370 = sbr.rel (%p518_p7) target bundleno = 1170 (0x492), region = 48 }
 0x3ba   : > { %v362_v61 = vstv %s528_s17 }
 0x3bb   : > { %v364_v62 = vsub.f32 %v363_v60, %v362_v61 }
 0x3bd   : > { %366 = vst.msk [vmem:[#allocation4] sm:$0x1] %vm365_vm3, %v364_v62 }
 0x3be   : > { %s374_s18 = scalar_select %p275_p8, 1, 0  ;;  %v371_v63 = vld [vmem:[#allocation2] sm:$0x3]  ;;  %v373_v0 = vld [vmem:[#allocation2 + $0x2] sm:$0x3] }
 0x3c0   : > { %v375_v1 = vstv %s374_s18 }
 0x3c1   : > { %vm376_vm4 = vcmp.eq.s32.totalorder %v375_v1, 1 }
 0x3c2   : > { %v377_v2 = vsel %vm376_vm4, %v371_v63, %v373_v0 }
 0x3c3   : > { %v379_v3 = vmul.f32 %v377_v2, %v349_v50 }
 0x3c4   : > { %v378_v12 = vld [vmem:[#allocation4] sm:$0x1] }
 0x3c5   : > { %v380_v4 = vsel %vm337_vm2, %v379_v3, 0.0 }
 0x3c6   : > { %381 = vadd.xlane.f32.xlu0 %v380_v4 }
 0x44f   : > { %v382_v5 = vpop.xlane.xlu0 %381 }
 0x450   : > { %v383_v6 = vrot.slane %v382_v5, 4 }
 0x452   : > { %v384_v7 = vadd.f32 %v383_v6, %v382_v5 }
 0x454   : > { %v385_v8 = vrot.slane %v384_v7, 2 }
 0x456   : > { %v386_v9 = vadd.f32 %v385_v8, %v384_v7 }
 0x458   : > { %v387_v10 = vrot.slane %v386_v9, 1 }
 0x45a   : > { %v388_v11 = vadd.f32 %v387_v10, %v386_v9 }
 0x45c   : > { %529 = vpush %v388_v11 }
 0x48d   : > { %s530_s19 = spop %529 }
 0x48e   : > { %v390_v13 = vstv %s530_s19 }
 0x48f   : > { %v391_v14 = vadd.f32 %v390_v13, %v378_v12 }
 0x491   : > { %392 = vst.msk [vmem:[#allocation4] sm:$0x1] %vm365_vm3, %v391_v14 }
 0x492 PF: > { %p519_p10 = scmp.ne.s32.totalorder %s706_s23, 3 }
 0x494   : > { %396 = sbr.rel (%p519_p10) target bundleno = 1181 (0x49d), region = 52 }
 0x499   : > { %v397_v15 = vld [vmem:[#allocation4] sm:$0x1] }
 0x49a   : > { %v398_v16 = vmul.f32 0.083333336, %v397_v15 }
 0x49c   : > { %399 = vst.msk [vmem:[#allocation9] sm:$0x1] %vm365_vm3, %v398_v16 }
 0x49d PF: > { %p868_p11 = scmp.eq.s32.totalorder %s508_s0, 3  ;;  %s718_s27 = smov [#allocation9]  }
 0x49e   : > { %s412_s28 = sshll.u32 %s718_s27, 4  ;;  %s413_s28 = int_to_ptr.vmem [resolvable:$true] %s412_s28 }
 0x49f   : > { %s636_s29 = scalar_lea.vmem %s413_s28, 16  ;;  %s642_s23 = scalar_lea.vmem %s413_s28, 32 }
 0x4a0   : > { %p637_p12 = scmp.ne.s32.totalorder %s413_s28, %s636_s29  ;;  %p643_p1 = scmp.lt.s32.totalorder %s413_s28, %s413_s28 }
 0x4a1   : > { %p644_p2 = scmp.lt.s32.totalorder %s642_s23, %s636_s29 }
 0x4a2   : > { %p638_p13 = pnand %p637_p12, %p868_p11 }
 0x4a3   : > { %p645_p3 = por %p644_p2, %p643_p1 }
 0x4a4   : > { %p639_p0 = pneg %p638_p13 }
 0x4a6   : > { %p646_p4 = pnand %p645_p3, %p639_p0 }
 0x4a8   : > { %649 = shalt.err (!%p646_p4)
}
 0x4a9   : > { %534 = dma.vmem_to_hbm [thread:$0]  (%p868_p11), %s413_s28, 16, %s905_s4, [#allocation8]  }
 0x4aa   : > { %689 = dma.done.wait (%p868_p11), [#allocation8], 16  }
 0x4ab   : > { %691 = vsyncadd (%p868_p11), [#allocation8], 4294967280 }
 0x4ac PF: > { %s21_s25 = sadd.s32 1, %s714_s25   ;;  %s911_s20 = smov %s698_s21 }
 0x4ad   : > { %p18_p5 = scmp.ge.s32.totalorder %s21_s25, 6   ;;  %s912_s21 = smov %s702_s22 }
 0x4ae   : > { %s913_s22 = smov %s803_s6  ;;  %s914_s23 = smov %s710_s24 }
 0x4af   : > { %s915_s24 = smov %s917_s26  ;;  %20 = sbr.rel (!%p18_p5) target bundleno = 7 (0x7), region = 102 }
 0x4b4   :  { %434 = vsyncpa [#allocation7], 1 }
 0x4b5   :  { %436 = vsyncpa [#allocation7 + $0x1], 1 }
 0x4b6   :  { %437 = vsyncpa [#allocation8], 1 }
 0x4b7   :  { %439 = vsyncpa [#allocation8 + $0x1], 1 }

</bundles_post_ra>
